<compile_context>
chip_gen: v5e
topology: v5e:2x2
jax: 0.10.0
libtpu: 0.0.40
codegen_flags: <defaults>
</compile_context>

<pallas_src>
import functools

import jax
import jax.numpy as jnp
from jax import lax
from jax.experimental import pallas as pl
from jax.experimental.pallas import tpu as pltpu


def _cdiv(a, b):
    return (a + b - 1) // b


def _round_up(x, m):
    return _cdiv(x, m) * m


def _const_spec(shape):
    """BlockSpec for a grid-invariant operand; single-buffered when supported."""
    index_map = lambda b, l: (0,) * len(shape)
    try:
        return pl.BlockSpec(shape, index_map, pipeline_mode=pl.Buffered(1))
    except Exception:  # older JAX without pipeline_mode / Buffered
        return pl.BlockSpec(shape, index_map)


def _vmem_limit_bytes():
    """Derive the VMEM limit from the chip, leaving headroom for Mosaic scratch."""
    try:
        cap = int(pltpu.get_tpu_info().vmem_capacity_bytes)
    except Exception:
        cap = 64 * 1024 * 1024  # assume the smallest (v7x per-TC) if the query fails
    return int(min(cap * 3 // 4, 96 * 1024 * 1024))


def _block_vmem_bytes(TB, TL, Sp, Dp, Ap, y_itemsize, attn_itemsize):
    bf, f32 = 2, 4
    act = 2 * (TB * TL * Dp + TB * Sp * Ap) * bf                 # double-buffered inputs
    out = 2 * TB * TL * (Dp * y_itemsize + Sp * attn_itemsize)   # double-buffered outputs
    wts = (Dp * Ap + Ap * Dp + Dp * Dp) * bf + (Ap + Dp) * f32   # single-buffered weights
    tmp = TB * TL * (2 * Sp + 2 * Ap) * f32                      # scores/exp + mapped/mix
    return act + out + wts + tmp


def _attn_compute(s_valid, out_ref, ctx_ref, waT_ref, ba_ref, wmT_ref, woT_ref, bo_ref):
    """out_ref: (TB, TL, Dp) bf16; ctx_ref: (TB, Sp, Ap) bf16; weights bf16, biases f32."""
    TB, TL, Dp = out_ref.shape
    _, Sp, Ap = ctx_ref.shape

    out_bf = out_ref[...]                                  # (TB, TL, Dp) bf16
    ctx_bf = ctx_ref[...]                                  # (TB, Sp, Ap) bf16
    out2d = out_bf.reshape(TB * TL, Dp)                    # layout-preserving leading-dim merge

    # mapped_output = attn_w(output) on the flattened slab (fills the MXU row dim), f32 acc
    mapped = jnp.dot(out2d, waT_ref[...],
                     preferred_element_type=jnp.float32) + ba_ref[...]
    mapped = mapped.reshape(TB, TL, Ap).astype(jnp.bfloat16)

    # scores = mapped_output @ context^T  (contract last dims -> no XLU transpose of ctx)
    scores = lax.dot_general(
        mapped, ctx_bf,
        dimension_numbers=(((2,), (2,)), ((0,), (0,))),
        preferred_element_type=jnp.float32)                # (TB, TL, Sp) f32

    if s_valid < Sp:                                       # mask zero-padded key positions
        col = lax.broadcasted_iota(jnp.int32, scores.shape, 2)
        scores = jnp.where(col < s_valid, scores, -jnp.inf)

    # softmax over input_len (f32 elementwise; reciprocal on the otherwise-idle EUP slot).
    # approx error ~2^-12 is below the bf16 writeback quantization of the attn output.
    m = jnp.max(scores, axis=-1, keepdims=True)
    e = jnp.exp(scores - m)
    attn = e * pl.reciprocal(jnp.sum(e, axis=-1, keepdims=True), approx=True)

    # mix = attn @ context
    mix = lax.dot_general(
        attn.astype(jnp.bfloat16), ctx_bf,
        dimension_numbers=(((2,), (1,)), ((0,), (0,))),
        preferred_element_type=jnp.float32)                # (TB, TL, Ap)

    # output = tanh(linear_out(cat([mix, output], -1))) = tanh(mix @ Wm^T + output @ Wo^T + b)
    proj = (jnp.dot(mix.reshape(TB * TL, Ap).astype(jnp.bfloat16), wmT_ref[...],
                    preferred_element_type=jnp.float32)
            + jnp.dot(out2d, woT_ref[...], preferred_element_type=jnp.float32)
            + bo_ref[...])
    return jnp.tanh(proj).reshape(TB, TL, Dp), attn


def _attention_kernel(s_valid, out_ref, ctx_ref, waT_ref, ba_ref, wmT_ref, woT_ref, bo_ref,
                      y_ref, attn_ref):
    y, attn = _attn_compute(s_valid, out_ref, ctx_ref, waT_ref, ba_ref, wmT_ref, woT_ref, bo_ref)
    y_ref[...] = y.astype(y_ref.dtype)
    attn_ref[...] = attn.astype(attn_ref.dtype)


def _attention_kernel_noattn(s_valid, out_ref, ctx_ref, waT_ref, ba_ref, wmT_ref, woT_ref, bo_ref,
                             y_ref):
    y, _ = _attn_compute(s_valid, out_ref, ctx_ref, waT_ref, ba_ref, wmT_ref, woT_ref, bo_ref)
    y_ref[...] = y.astype(y_ref.dtype)


def attention_general_project(output, context, w_attn, b_attn, w_out, b_out, *,
                              return_attn=True, l_tile=512, attn_dtype=jnp.bfloat16):
    """
    output : [B, L, D]   decoder features (dec_size D)
    context: [B, S, A]   encoder features (attn_size A)
    w_attn : [A, D], b_attn : [A]      (attn_w = nn.Linear(dec_size, attn_size))
    w_out  : [D, D+A], b_out : [D]     (linear_out = nn.Linear(dec_size + attn_size, dec_size))
    Returns (attended_output [B, L, D], attn [B, L, S] or None).
    Note: attn is written in `attn_dtype` (bf16 default) to halve its HBM writeback.
    """
    B, L, D = output.shape
    Bc, S, A = context.shape
    assert Bc == B, "batch mismatch between output and context"
    out_dtype = output.dtype

    # lane-dense padding: last dims of every block become multiples of 128
    Dp, Ap, Sp = _round_up(D, 128), _round_up(A, 128), _round_up(S, 128)

    # ---- tile selection -------------------------------------------------------------
    Lp8 = _round_up(L, 8)
    TL = min(Lp8, max(8, (l_tile // 8) * 8))
    target_rows = 256                       # MXU row fill target (v6e/v7x 2x256; ok on v5e)
    TB = max(1, min(B, target_rows // TL)) if TL < target_rows else 1

    vmem_limit = _vmem_limit_bytes()
    budget = int(vmem_limit * 0.8)
    y_sz = jnp.dtype(out_dtype).itemsize
    a_sz = jnp.dtype(attn_dtype).itemsize if return_attn else 0
    while _block_vmem_bytes(TB, TL, Sp, Dp, Ap, y_sz, a_sz) > budget:
        if TB > 1:
            TB = max(1, TB // 2)
        elif TL > 8:
            TL = max(8, TL // 2)
        else:
            break

    num_l = _cdiv(Lp8, TL)
    # megacore: keep >= 2 parallel grid points when the batch allows (v7x has 2 TCs)
    if B >= 2 and num_l * _cdiv(B, TB) < 2:
        TB = (B + 1) // 2
    num_b = _cdiv(B, TB)
    B_pad, L_pad = num_b * TB, num_l * TL

    # ---- pad + cast activations once in the wrapper (halves DMA bytes vs f32) --------
    out_p = jnp.pad(output.astype(jnp.bfloat16),
                    ((0, B_pad - B), (0, L_pad - L), (0, Dp - D)))
    ctx_p = jnp.pad(context.astype(jnp.bfloat16),
                    ((0, B_pad - B), (0, Sp - S), (0, Ap - A)))

    # weights: pre-transposed, zero-padded, bf16 (cast once); biases stay f32
    w_attn = jnp.asarray(w_attn, jnp.float32)
    w_out = jnp.asarray(w_out, jnp.float32)
    waT = jnp.pad(w_attn.T, ((0, Dp - D), (0, Ap - A))).astype(jnp.bfloat16)        # (Dp, Ap)
    ba = jnp.pad(jnp.asarray(b_attn, jnp.float32), (0, Ap - A)).reshape(1, Ap)      # (1, Ap)
    # combined = cat((mix, output), dim=2): first A cols act on mix, next D on output
    wmT = jnp.pad(w_out[:, :A].T, ((0, Ap - A), (0, Dp - D))).astype(jnp.bfloat16)  # (Ap, Dp)
    woT = jnp.pad(w_out[:, A:].T, ((0, Dp - D), (0, Dp - D))).astype(jnp.bfloat16)  # (Dp, Dp)
    bo = jnp.pad(jnp.asarray(b_out, jnp.float32), (0, Dp - D)).reshape(1, Dp)       # (1, Dp)

    in_specs = [
        pl.BlockSpec((TB, TL, Dp), lambda b, l: (b, l, 0)),   # decoder output tile
        # full (padded) context per batch tile; its index map does not depend on l, and l
        # is the innermost grid axis, so this DMA is elided across l-tiles. Do not reorder.
        pl.BlockSpec((TB, Sp, Ap), lambda b, l: (b, 0, 0)),
        _const_spec((Dp, Ap)),    # attn_w weight^T          (single-buffered constant)
        _const_spec((1, Ap)),     # attn_w bias
        _const_spec((Ap, Dp)),    # linear_out (mix half)^T
        _const_spec((Dp, Dp)),    # linear_out (output half)^T
        _const_spec((1, Dp)),     # linear_out bias
    ]
    y_spec = pl.BlockSpec((TB, TL, Dp), lambda b, l: (b, l, 0))

    cparams = pltpu.CompilerParams(
        dimension_semantics=("parallel", "parallel"),
        vmem_limit_bytes=vmem_limit,
    )
    grid = (num_b, num_l)
    args = (out_p, ctx_p, waT, ba, wmT, woT, bo)

    if return_attn:
        y_p, attn_p = pl.pallas_call(
            functools.partial(_attention_kernel, S),
            out_shape=(
                jax.ShapeDtypeStruct((B_pad, L_pad, Dp), out_dtype),
                jax.ShapeDtypeStruct((B_pad, L_pad, Sp), attn_dtype),
            ),
            grid_spec=pltpu.PrefetchScalarGridSpec(
                num_scalar_prefetch=0,
                grid=grid,
                in_specs=in_specs,
                out_specs=[
                    y_spec,
                    pl.BlockSpec((TB, TL, Sp), lambda b, l: (b, l, 0)),
                ],
            ),
            compiler_params=cparams,
        )(*args)
        return y_p[:B, :L, :D], attn_p[:B, :L, :S]

    y_p = pl.pallas_call(
        functools.partial(_attention_kernel_noattn, S),
        out_shape=jax.ShapeDtypeStruct((B_pad, L_pad, Dp), out_dtype),
        grid_spec=pltpu.PrefetchScalarGridSpec(
            num_scalar_prefetch=0,
            grid=grid,
            in_specs=in_specs,
            out_specs=y_spec,
        ),
        compiler_params=cparams,
    )(*args)
    return y_p[:B, :L, :D], None


def _reference(output, context, w_attn, b_attn, w_out, b_out):
    # Pure-JAX f32 reference matching the PyTorch forward (mode='general', project=True).
    mapped = jnp.einsum('bld,ad->bla', output, w_attn) + b_attn
    scores = jnp.einsum('bla,bsa->bls', mapped, context)
    attn = jax.nn.softmax(scores, axis=-1)
    mix = jnp.einsum('bls,bsa->bla', attn, context)
    combined = jnp.concatenate([mix, output], axis=-1)
    y = jnp.tanh(jnp.einsum('blc,dc->bld', combined, w_out) + b_out)
    return y, attn


if __name__ == "__main__":
    B, L, S = 2, 8, 8          # batch, out_len, in_len
    D, A = 32, 32              # dec_size, attn_size

    key = jax.random.PRNGKey(0)
    k1, k2, k3, k4, k5, k6 = jax.random.split(key, 6)

    output = jax.random.normal(k1, (B, L, D), dtype=jnp.float32)
    context = jax.random.normal(k2, (B, S, A), dtype=jnp.float32)

    # Parameter shapes from Attention.__init__ (mode='general', project=True)
    w_attn = 0.1 * jax.random.normal(k3, (A, D), dtype=jnp.float32)        # attn_w.weight
    b_attn = 0.1 * jax.random.normal(k4, (A,), dtype=jnp.float32)          # attn_w.bias
    w_out = 0.1 * jax.random.normal(k5, (D, D + A), dtype=jnp.float32)     # linear_out.weight
    b_out = 0.1 * jax.random.normal(k6, (D,), dtype=jnp.float32)           # linear_out.bias

    y, attn = attention_general_project(output, context, w_attn, b_attn, w_out, b_out)
    y2, _ = attention_general_project(output, context, w_attn, b_attn, w_out, b_out,
                                      return_attn=False)
    jax.block_until_ready((y, attn, y2))

    y_ref, attn_ref = _reference(output, context, w_attn, b_attn, w_out, b_out)

    # bf16 matmul operands, bf16 attn writeback and approx reciprocal -> relaxed tolerance
    tol = dict(atol=4e-2, rtol=4e-2)
    assert jnp.allclose(y, y_ref, **tol), "output mismatch"
    assert jnp.allclose(attn.astype(jnp.float32), attn_ref, **tol), "attn mismatch"
    assert jnp.allclose(y2, y_ref, **tol), "output (no-attn path) mismatch"

    print("KERNEL_OK")
</pallas_src>

<mosaic_0001>
module attributes {stable_mosaic.version = 11 : i64} {
  func.func @_attention_kernel(%arg0: i32, %arg1: i32, %arg2: memref<1x8x128xbf16, #tpu.memory_space<vmem>>, %arg3: memref<1x128x128xbf16, #tpu.memory_space<vmem>>, %arg4: memref<128x128xbf16, #tpu.memory_space<vmem>>, %arg5: memref<1x128xf32, #tpu.memory_space<vmem>>, %arg6: memref<128x128xbf16, #tpu.memory_space<vmem>>, %arg7: memref<128x128xbf16, #tpu.memory_space<vmem>>, %arg8: memref<1x128xf32, #tpu.memory_space<vmem>>, %arg9: memref<1x8x128xf32, #tpu.memory_space<vmem>>, %arg10: memref<1x8x128xbf16, #tpu.memory_space<vmem>>) attributes {dimension_semantics = [#tpu.dimension_semantics<parallel>, #tpu.dimension_semantics<parallel>], iteration_bounds = array<i64: 2, 1>, scalar_prefetch = 0 : i64, scratch_operands = 0 : i64, tpu.core_type = #tpu.core_type<tc>, window_params = [{transform_indices = @transform_0, window_bounds = array<i64: 1, 8, 128>}, {transform_indices = @transform_1, window_bounds = array<i64: 1, 128, 128>}, {pipeline_mode = #tpu.pipeline_mode<synchronous>, transform_indices = @transform_2, window_bounds = array<i64: 128, 128>}, {pipeline_mode = #tpu.pipeline_mode<synchronous>, transform_indices = @transform_3, window_bounds = array<i64: 1, 128>}, {pipeline_mode = #tpu.pipeline_mode<synchronous>, transform_indices = @transform_4, window_bounds = array<i64: 128, 128>}, {pipeline_mode = #tpu.pipeline_mode<synchronous>, transform_indices = @transform_5, window_bounds = array<i64: 128, 128>}, {pipeline_mode = #tpu.pipeline_mode<synchronous>, transform_indices = @transform_6, window_bounds = array<i64: 1, 128>}, {transform_indices = @transform_7, window_bounds = array<i64: 1, 8, 128>}, {transform_indices = @transform_8, window_bounds = array<i64: 1, 8, 128>}]} {
    %c0 = arith.constant 0 : index
    %c0_0 = arith.constant 0 : index
    %c0_1 = arith.constant 0 : index
    %0 = vector.load %arg2[%c0, %c0_0, %c0_1] : memref<1x8x128xbf16, #tpu.memory_space<vmem>>, vector<1x8x128xbf16>
    %c0_2 = arith.constant 0 : index
    %c0_3 = arith.constant 0 : index
    %c0_4 = arith.constant 0 : index
    %1 = vector.load %arg3[%c0_2, %c0_3, %c0_4] : memref<1x128x128xbf16, #tpu.memory_space<vmem>>, vector<1x128x128xbf16>
    %2 = vector.shape_cast %0 : vector<1x8x128xbf16> to vector<8x128xbf16>
    %c0_5 = arith.constant 0 : index
    %c0_6 = arith.constant 0 : index
    %3 = vector.load %arg4[%c0_5, %c0_6] : memref<128x128xbf16, #tpu.memory_space<vmem>>, vector<128x128xbf16>
    %cst = arith.constant dense<0.000000e+00> : vector<8x128xf32>
    %4 = tpu.matmul %2, %3, %cst {dimension_numbers = #tpu.dot_dimension_numbers<[1], [0], [0], [1], [0, 0, 1, 1], [], []>} : vector<8x128xbf16>, vector<128x128xbf16>, vector<8x128xf32> -> vector<8x128xf32>
    %c0_7 = arith.constant 0 : index
    %c0_8 = arith.constant 0 : index
    %5 = vector.load %arg5[%c0_7, %c0_8] : memref<1x128xf32, #tpu.memory_space<vmem>>, vector<1x128xf32>
    %6 = vector.broadcast %5 : vector<1x128xf32> to vector<8x128xf32>
    %7 = arith.addf %4, %6 : vector<8x128xf32>
    %8 = vector.shape_cast %7 : vector<8x128xf32> to vector<1x8x128xf32>
    %9 = arith.truncf %8 : vector<1x8x128xf32> to vector<1x8x128xbf16>
    %cst_9 = arith.constant dense<0.000000e+00> : vector<1x8x128xf32>
    %10 = tpu.matmul %9, %1, %cst_9 {dimension_numbers = #tpu.dot_dimension_numbers<[2], [2], [1], [1], [0, 0, 0, 1, 1, 1], [0], [0]>} : vector<1x8x128xbf16>, vector<1x128x128xbf16>, vector<1x8x128xf32> -> vector<1x8x128xf32>
    %11 = tpu.iota {dimensions = array<i32: 2>} : vector<1x8x128xi32>
    %c8_i32 = arith.constant 8 : i32
    %12 = vector.broadcast %c8_i32 : i32 to vector<1x8x128xi32>
    %13 = arith.cmpi slt, %11, %12 : vector<1x8x128xi32>
    %cst_10 = arith.constant 0xFF800000 : f32
    %14 = vector.broadcast %cst_10 : f32 to vector<1x8x128xf32>
    %15 = arith.select %13, %10, %14 : vector<1x8x128xi1>, vector<1x8x128xf32>
    %cst_11 = arith.constant dense<0xFF800000> : vector<1x8xf32>
    %16 = vector.multi_reduction <maximumf>, %15, %cst_11 [2] : vector<1x8x128xf32> to vector<1x8xf32>
    %17 = vector.shape_cast %16 : vector<1x8xf32> to vector<1x8x1xf32>
    %18 = vector.broadcast %17 : vector<1x8x1xf32> to vector<1x8x128xf32>
    %19 = arith.subf %15, %18 : vector<1x8x128xf32>
    %20 = math.exp %19 : vector<1x8x128xf32>
    %cst_12 = arith.constant dense<0.000000e+00> : vector<1x8xf32>
    %21 = vector.multi_reduction <add>, %20, %cst_12 [2] : vector<1x8x128xf32> to vector<1x8xf32>
    %22 = vector.shape_cast %21 : vector<1x8xf32> to vector<1x8x1xf32>
    %23 = tpu.reciprocal %22 {approx = true} : vector<1x8x1xf32> -> vector<1x8x1xf32>
    %24 = vector.broadcast %23 : vector<1x8x1xf32> to vector<1x8x128xf32>
    %25 = arith.mulf %20, %24 : vector<1x8x128xf32>
    %26 = arith.truncf %25 : vector<1x8x128xf32> to vector<1x8x128xbf16>
    %cst_13 = arith.constant dense<0.000000e+00> : vector<1x8x128xf32>
    %27 = tpu.matmul %26, %1, %cst_13 {dimension_numbers = #tpu.dot_dimension_numbers<[2], [1], [1], [2], [0, 0, 0, 1, 1, 2], [0], [0]>} : vector<1x8x128xbf16>, vector<1x128x128xbf16>, vector<1x8x128xf32> -> vector<1x8x128xf32>
    %28 = vector.shape_cast %27 : vector<1x8x128xf32> to vector<8x128xf32>
    %29 = arith.truncf %28 : vector<8x128xf32> to vector<8x128xbf16>
    %c0_14 = arith.constant 0 : index
    %c0_15 = arith.constant 0 : index
    %30 = vector.load %arg6[%c0_14, %c0_15] : memref<128x128xbf16, #tpu.memory_space<vmem>>, vector<128x128xbf16>
    %cst_16 = arith.constant dense<0.000000e+00> : vector<8x128xf32>
    %31 = tpu.matmul %29, %30, %cst_16 {dimension_numbers = #tpu.dot_dimension_numbers<[1], [0], [0], [1], [0, 0, 1, 1], [], []>} : vector<8x128xbf16>, vector<128x128xbf16>, vector<8x128xf32> -> vector<8x128xf32>
    %c0_17 = arith.constant 0 : index
    %c0_18 = arith.constant 0 : index
    %32 = vector.load %arg7[%c0_17, %c0_18] : memref<128x128xbf16, #tpu.memory_space<vmem>>, vector<128x128xbf16>
    %cst_19 = arith.constant dense<0.000000e+00> : vector<8x128xf32>
    %33 = tpu.matmul %2, %32, %cst_19 {dimension_numbers = #tpu.dot_dimension_numbers<[1], [0], [0], [1], [0, 0, 1, 1], [], []>} : vector<8x128xbf16>, vector<128x128xbf16>, vector<8x128xf32> -> vector<8x128xf32>
    %34 = arith.addf %31, %33 : vector<8x128xf32>
    %c0_20 = arith.constant 0 : index
    %c0_21 = arith.constant 0 : index
    %35 = vector.load %arg8[%c0_20, %c0_21] : memref<1x128xf32, #tpu.memory_space<vmem>>, vector<1x128xf32>
    %36 = vector.broadcast %35 : vector<1x128xf32> to vector<8x128xf32>
    %37 = arith.addf %34, %36 : vector<8x128xf32>
    %38 = math.tanh %37 : vector<8x128xf32>
    %39 = vector.shape_cast %38 : vector<8x128xf32> to vector<1x8x128xf32>
    %c0_22 = arith.constant 0 : index
    %c0_23 = arith.constant 0 : index
    %c0_24 = arith.constant 0 : index
    %40 = vector.load %arg9[%c0_22, %c0_23, %c0_24] : memref<1x8x128xf32, #tpu.memory_space<vmem>>, vector<1x8x128xf32>
    tpu.vector_store %arg9[%c0_22, %c0_23, %c0_24], %39 {strides = array<i32>} : memref<1x8x128xf32, #tpu.memory_space<vmem>>, vector<1x8x128xf32>,
    %41 = arith.truncf %25 : vector<1x8x128xf32> to vector<1x8x128xbf16>
    %c0_25 = arith.constant 0 : index
    %c0_26 = arith.constant 0 : index
    %c0_27 = arith.constant 0 : index
    %42 = vector.load %arg10[%c0_25, %c0_26, %c0_27] : memref<1x8x128xbf16, #tpu.memory_space<vmem>>, vector<1x8x128xbf16>
    tpu.vector_store %arg10[%c0_25, %c0_26, %c0_27], %41 {strides = array<i32>} : memref<1x8x128xbf16, #tpu.memory_space<vmem>>, vector<1x8x128xbf16>,
    return
  }
  func.func @transform_0(%arg0: i32, %arg1: i32) -> (i32, i32, i32) {
    %c0_i32 = arith.constant 0 : i32
    %c0_i32_0 = arith.constant 0 : i32
    return %arg0, %arg1, %c0_i32 : i32, i32, i32
  }
  func.func @transform_1(%arg0: i32, %arg1: i32) -> (i32, i32, i32) {
    %c0_i32 = arith.constant 0 : i32
    %c0_i32_0 = arith.constant 0 : i32
    %c0_i32_1 = arith.constant 0 : i32
    return %arg0, %c0_i32, %c0_i32_0 : i32, i32, i32
  }
  func.func @transform_2(%arg0: i32, %arg1: i32) -> (i32, i32) {
    %c0_i32 = arith.constant 0 : i32
    %c0_i32_0 = arith.constant 0 : i32
    %c0_i32_1 = arith.constant 0 : i32
    return %c0_i32, %c0_i32_0 : i32, i32
  }
  func.func @transform_3(%arg0: i32, %arg1: i32) -> (i32, i32) {
    %c0_i32 = arith.constant 0 : i32
    %c0_i32_0 = arith.constant 0 : i32
    %c0_i32_1 = arith.constant 0 : i32
    return %c0_i32, %c0_i32_0 : i32, i32
  }
  func.func @transform_4(%arg0: i32, %arg1: i32) -> (i32, i32) {
    %c0_i32 = arith.constant 0 : i32
    %c0_i32_0 = arith.constant 0 : i32
    %c0_i32_1 = arith.constant 0 : i32
    return %c0_i32, %c0_i32_0 : i32, i32
  }
  func.func @transform_5(%arg0: i32, %arg1: i32) -> (i32, i32) {
    %c0_i32 = arith.constant 0 : i32
    %c0_i32_0 = arith.constant 0 : i32
    %c0_i32_1 = arith.constant 0 : i32
    return %c0_i32, %c0_i32_0 : i32, i32
  }
  func.func @transform_6(%arg0: i32, %arg1: i32) -> (i32, i32) {
    %c0_i32 = arith.constant 0 : i32
    %c0_i32_0 = arith.constant 0 : i32
    %c0_i32_1 = arith.constant 0 : i32
    return %c0_i32, %c0_i32_0 : i32, i32
  }
  func.func @transform_7(%arg0: i32, %arg1: i32) -> (i32, i32, i32) {
    %c0_i32 = arith.constant 0 : i32
    %c0_i32_0 = arith.constant 0 : i32
    return %arg0, %arg1, %c0_i32 : i32, i32, i32
  }
  func.func @transform_8(%arg0: i32, %arg1: i32) -> (i32, i32, i32) {
    %c0_i32 = arith.constant 0 : i32
    %c0_i32_0 = arith.constant 0 : i32
    return %arg0, %arg1, %c0_i32 : i32, i32, i32
  }
}

</mosaic_0001>

<bundles_post_ra>
// kernel: tpu_custom_call.1
= control target key start
LH: loop header
LB: loop body
LE: loop exit
PB: predicated region body
PF: predicated region fallthrough
CT: control target
= control target key end

     0   :  { %s1853_s0 = inlined_call_operand.hbm [shape: bf16[2,8,128], index: 0, kind: input, shape index: {}]   ;;  %s1854_s1 = inlined_call_operand.hbm [shape: bf16[2,128,128], index: 1, kind: input, shape index: {}]   ;;  %s1855_s2 = inlined_call_operand.hbm [shape: bf16[128,128], index: 2, kind: input, shape index: {}]   ;;  %s1856_s3 = inlined_call_operand.vmem [shape: f32[1,128], index: 3, kind: input, shape index: {}]   ;;  %s1857_s4 = inlined_call_operand.hbm [shape: bf16[128,128], index: 4, kind: input, shape index: {}]   ;;  %s1858_s5 = inlined_call_operand.hbm [shape: bf16[128,128], index: 5, kind: input, shape index: {}]   ;;  %s1859_s6 = inlined_call_operand.vmem [shape: f32[1,128], index: 6, kind: input, shape index: {}]   ;;  %s1860_s7 = inlined_call_operand.hbm [shape: f32[2,8,128], index: 7, kind: output, shape index: {0}]   ;;  %s1861_s8 = inlined_call_operand.hbm [shape: bf16[2,8,128], index: 8, kind: output, shape index: {1}]  }
   0x1   :  { %1869 = sst [smem:[#allocation25_spill]] %s1855_s2 }
   0x2   :  { %1870 = sst [smem:[#allocation26_spill]] %s1857_s4 }
   0x3   :  { %1871 = sst [smem:[#allocation27_spill]] %s1858_s5 }
   0x4   :  { %1872 = sst [smem:[#allocation28_spill]] %s1860_s7 }
   0x5   :  { %14 = vsyncpa [#allocation3], 0 }
   0x6   :  { %16 = vsyncpa [#allocation3 + $0x1], 0 }
   0x7   :  { %17 = vsyncpa [#allocation6], 0 }
   0x8   :  { %19 = vsyncpa [#allocation6 + $0x1], 0 }
   0x9   :  { %20 = vsyncpa [#allocation9], 0 }
   0xa   :  { %21 = vsyncpa [#allocation4], 0 }
   0xb   :  { %23 = vsyncpa [#allocation4 + $0x1], 0 }
   0xc   :  { %24 = vsyncpa [#allocation13], 0 }
   0xd   :  { %26 = vsyncpa [#allocation13 + $0x1], 0  ;;  %s1624_s27 = smov 0   ;;  %s1626_s28 = smov 0  }
   0xe   :  { %s1628_s29 = smov 0   ;;  %s1630_s30 = smov 0  }
   0xf   :  { %s1632_s9 = smov 0   ;;  %s1634_s10 = smov 0  }
  0x10 LB: > { %1873 = sst [smem:[#allocation20_spill]] %s1552_s27  ;;  %s1655_s11 = sadd.s32 4294967295, %s1572_s10   ;;  %s1572_s10 = sphi %s1634_s10, %s32_s10   ;;  %s1568_s9 = sphi %s1632_s9, %s1898_s9   ;;  %s1564_s30 = sphi %s1630_s30, %s1897_s30   ;;  %s1560_s29 = sphi %s1628_s29, %s1893_s29   ;;  %s1556_s28 = sphi %s1626_s28, %s1896_s28   ;;  %s1552_s27 = sphi %s1624_s27, %s1895_s27  }
  0x11   : > { %1874 = sst [smem:[#allocation21_spill]] %s1560_s29  ;;  %p998_p0 = scmp.ge.s32.totalorder %s1572_s10, 1 }
  0x12   : > { %p67_p1 = scmp.eq.s32.totalorder %s1655_s11, 0  ;;  %p264_p2 = scmp.lt.s32.totalorder %s1572_s10, 3 }
  0x13   : > { %s1875_s2 = sld [smem:[#allocation25_spill]]  ;;  %s1574_s16 = smov [#allocation7]  }
  0x14   : > { %p1663_p3 = pnand %p998_p0, %p264_p2  ;;  %s277_s17 = sshll.u32 %s1574_s16, 4  ;;  %s278_s17 = int_to_ptr.vmem [resolvable:$true] %s277_s17 }
  0x15   : > { %p1002_p6 = scmp.ge.s32.totalorder %s1572_s10, 2  ;;  %s1878_s4 = sld [smem:[#allocation26_spill]] }
  0x16   : > { %p1203_p4 = pneg %p1663_p3  ;;  %s1862_s22 = smov 64  }
  0x17   : > { %s1863_s23 = smov 4   ;;  %s1577_s24 = smov [#allocation8]  }
  0x18   : > { %p1671_p5 = pnand %p1203_p4, %p67_p1  ;;  %s294_s25 = sshll.u32 %s1577_s24, 4  ;;  %s295_s25 = int_to_ptr.vmem [resolvable:$true] %s294_s25 }
  0x19   : > { %s275_s14 = sshll.u32 %s1875_s2, 4  ;;  %s1879_s5 = sld [smem:[#allocation27_spill]]  ;;  %s276_s14 = int_to_ptr.hbm [resolvable:$true] %s275_s14 }
  0x1a   : > { %1206 = dma.hbm_to_vmem [thread:$0]  (!%p1671_p5), %s276_s14, 1024, %s278_s17, [#allocation6], %s1862_s22, %s1862_s22, %s1863_s23  }
  0x1b   : > { %s292_s21 = sshll.u32 %s1878_s4, 4  ;;  %s1578_s14 = smov [#allocation10]   ;;  %s293_s21 = int_to_ptr.hbm [resolvable:$true] %s292_s21 }
  0x1c   : > { %1209 = dma.hbm_to_vmem [thread:$0]  (!%p1671_p5), %s293_s21, 1024, %s295_s25, [#allocation9], %s1862_s22, %s1862_s22, %s1863_s23  }
  0x1d   : > { %s308_s16 = sshll.u32 %s1578_s14, 4  ;;  %s997_s17 = sadd.s32 4294967294, %s1572_s10   ;;  %s309_s16 = int_to_ptr.vmem [resolvable:$true] %s308_s16 }
  0x1e   : > { %s44_s19 = sadd.s32 1, %s1568_s9  ;;  %s53_s20 = sadd.s32 1, %s1560_s29 }
  0x1f   : > { %s306_s13 = sshll.u32 %s1879_s5, 4  ;;  %p46_p7 = scmp.ge.s32.totalorder %s44_s19, 2  ;;  %s307_s13 = int_to_ptr.hbm [resolvable:$true] %s306_s13 }
  0x20   : > { %1212 = dma.hbm_to_vmem [thread:$0]  (!%p1671_p5), %s307_s13, 1024, %s309_s16, [#allocation9], %s1862_s22, %s1862_s22, %s1863_s23  }
  0x21   : > { %p60_p8 = scmp.ne.s32.totalorder %s1560_s29, %s1556_s28  ;;  %p61_p9 = scmp.eq.s32.totalorder %s1572_s10, 0 }
  0x22   : > { %p66_p10 = scmp.ne.s32.totalorder %s1556_s28, %s1552_s27  ;;  %s1900_s19 = smov (%p46_p7, %s44_s19), 0 }
  0x23   : > { %1880 = sst [smem:[#allocation22_spill]] %s1900_s19  ;;  %p1707_p11 = por %p61_p9, %p60_p8 }
  0x24   : > { %p1713_p12 = por %p67_p1, %p66_p10  ;;  %s48_s24 = ssub.s32 %s1568_s9, %s1900_s19 }
  0x25   : > { %p223_p13 = scmp.eq.s32.totalorder %s1655_s11, 1  ;;  %p51_p0 = scmp.eq.s32.totalorder %s48_s24, 0 }
  0x26   : > { %p229_p2 = scmp.eq.s32.totalorder %s997_s17, 1  ;;  %p1230_p5 = scmp.lt.s32.totalorder %s1572_s10, 2 }
  0x27   : > { %p1720_p4 = por %p223_p13, %p60_p8  ;;  %s325_s13 = sand.u32 1, %s1560_s29  }
  0x28   : > { %s1726_s26 = scalar_select %p51_p0, %s1560_s29, %s53_s20  }
  0x29   : > { %p1728_p7 = por %p229_p2, %p66_p10  ;;  %s1003_s14 = sshll.u32 %s325_s13, 2 }
  0x2a   : > { %1884 = sst [smem:[#allocation23_spill]] %s1726_s26  ;;  %s1004_s16 = sshll.u32 %s1568_s9, 2 }
  0x2b   : > { %s1885_s12 = scalar_select %p1728_p7, 1, 0 }
  0x2c   : > { %s334_s17 = scalar_lea.hbm %s1853_s0, %s1004_s16  ;;  %s329_s24 = scalar_lea.vmem [#allocation2], %s1003_s14 }
  0x2d   : > { %1886 = sst [smem:[#allocation24_spill]] %s1885_s12  ;;  %s338_s2 = sshll.u32 %s329_s24, 4  ;;  %s339_s2 = int_to_ptr.vmem [resolvable:$true] %s338_s2 }
  0x2e   : > { %s336_s4 = sshll.u32 %s334_s17, 4  ;;  %p1214_p8 = pnand %p1230_p5, %p1707_p11  ;;  %s337_s4 = int_to_ptr.hbm [resolvable:$true] %s336_s4 }
  0x2f   : > { %s1005_s20 = sshll.u32 %s325_s13, 6  ;;  %s1150_s5 = sshll.u32 %s1568_s9, 6 }
  0x30   : > { %s326_s19 = scalar_lea.sflag [#allocation3], %s325_s13  ;;  %s349_s26 = scalar_lea.vmem [#allocation5], %s1005_s20 }
  0x31   : > { %1216 = dma.hbm_to_vmem [thread:$0]  (!%p1214_p8), %s337_s4, 64, %s339_s2, %s326_s19  }
  0x32   : > { %s357_s29 = sshll.u32 %s349_s26, 4  ;;  %s345_s12 = sand.u32 1, %s1572_s10   ;;  %s358_s29 = int_to_ptr.vmem [resolvable:$true] %s357_s29 }
  0x33   : > { %s354_s22 = scalar_lea.hbm %s1854_s1, %s1150_s5  ;;  %s346_s14 = scalar_lea.sflag [#allocation6], %s345_s12 }
  0x34   : > { %s355_s23 = sshll.u32 %s354_s22, 4  ;;  %s1887_s16 = smov 4   ;;  %s356_s23 = int_to_ptr.hbm [resolvable:$true] %s355_s23 }
  0x35   : > { %s1888_s17 = smov 64   ;;  %369 = sbr.rel (%p1663_p3) target bundleno = 883 (0x373), region = 48 }
  0x36   : > { %1219 = dma.hbm_to_vmem [thread:$0]  (!%p1214_p8), %s356_s23, 1024, %s358_s29, %s346_s14, %s1888_s17, %s1888_s17, %s1887_s16  }
  0x37   : > { %s1750_s2 = sand.u32 (!%p1663_p3), 1, %s1556_s28  }
  0x38   : > { %s1009_s4 = sshll.u32 (!%p1663_p3), %s1750_s2, 2  ;;  %s372_s7 = scalar_lea.sflag (!%p1663_p3), [#allocation3], %s1750_s2 }
  0x39   : > { %s1756_s5 = scalar_lea.vmem (!%p1663_p3), [#allocation2], %s1009_s4 }
  0x3a   : > { %1527 = dma.done.wait (%p1713_p12), %s372_s7, 64  }
  0x3b   : > { %1529 = vsyncadd (%p1713_p12), %s372_s7, 4294967232  ;;  %s381_s27 = sand.u32 1, %s1655_s11   ;;  %s1010_s29 = sshll.u32 %s1750_s2, 6 }
  0x3c   : > { %s382_s15 = scalar_lea.sflag [#allocation6], %s381_s27  ;;  %s1764_s19 = scalar_lea.vmem [#allocation5], %s1010_s29 }
  0x3d   : > { %1531 = dma.done.wait (%p1713_p12), %s382_s15, 1024  }
  0x3e   : > { %1533 = vsyncadd (%p1713_p12), %s382_s15, 4294966272 }
  0x3f   : > { %1535 = dma.done.wait (%p67_p1), [#allocation6], 1024  }
  0x40   : > { %1537 = vsyncadd (%p67_p1), [#allocation6], 4294966272 }
  0x41   : > { %1539 = dma.done.wait (%p67_p1), [#allocation9], 2048  }
  0x42   : > { %1541 = vsyncadd (%p67_p1), [#allocation9], 4294965248  ;;  %v1166_v0 = vld [vmem:[#allocation7 + $0x38] sm:$0xff]  ;;  %v1165_v1 = vld [vmem:[#allocation7 + $0x30] sm:$0xff]  ;;  %v604_v22 = vlaneseq  ;;  %s443_s21 = scalar_lea.vmem [#allocation12], %s1009_s4  ;;  %s1147_s26 = sshll.u32 %s1564_s30, 2 }
  0x43   : > { %529 = vmatpush.bf16.msra.mxu0 %v1166_v0  ;;  %v1158_v2 = vld [vmem:[%s1764_s19 + $0x38] sm:$0xff]  ;;  %v1164_v3 = vld [vmem:[#allocation7 + $0x28] sm:$0xff]  ;;  %v1157_v4 = vld [vmem:[%s1764_s19 + $0x30] sm:$0xff]  ;;  %s826_s24 = scalar_lea.hbm %s1861_s8, %s1147_s26  ;;  %s828_s20 = sshll.u32 %s443_s21, 4  ;;  %s829_s20 = int_to_ptr.vmem [resolvable:$true] %s828_s20 }
  0x44   : > { %591 = vmatpush.bf16.xpose.msra.mxu1 %v1158_v2  ;;  %618 = vmatpush.bf16.msra.mxu2 %v1158_v2  ;;  %v1163_v5 = vld [vmem:[#allocation7 + $0x20] sm:$0xff]  ;;  %v1156_v6 = vld [vmem:[%s1764_s19 + $0x28] sm:$0xff]  ;;  %v1162_v7 = vld [vmem:[#allocation7 + $0x18] sm:$0xff]  ;;  %v605_v23 = vand.u32 127, %v604_v22  ;;  %s830_s22 = sshll.u32 %s826_s24, 4  ;;  %s800_s23 = scalar_lea.sflag [#allocation13], %s1750_s2  ;;  %s831_s22 = int_to_ptr.hbm [resolvable:$true] %s830_s22 }
  0x45   : > { %v1155_v8 = vld [vmem:[%s1764_s19 + $0x20] sm:$0xff]  ;;  %v1161_v9 = vld [vmem:[#allocation7 + $0x10] sm:$0xff]  ;;  %v1154_v10 = vld [vmem:[%s1764_s19 + $0x18] sm:$0xff]  ;;  %s1460_s14 = sshra.s32 %s831_s22, 4  ;;  %s1466_s7 = scalar_lea.hbm %s1861_s8, 8  ;;  %s1461_s14 = int_to_ptr.hbm [resolvable:$true] %s1460_s14 }
  0x46   : > { %v1160_v11 = vld [vmem:[#allocation7 + $0x8] sm:$0xff]  ;;  %v1153_v12 = vld [vmem:[%s1764_s19 + $0x10] sm:$0xff]  ;;  %v1159_v13 = vld [vmem:[#allocation7] sm:$0xff]  ;;  %vm606_vm0 = vcmp.lt.s32.totalorder %v605_v23, 8  ;;  %s1462_s16 = scalar_lea.hbm %s1461_s14, 4  ;;  %p1467_p10 = scmp.lt.s32.totalorder %s1461_s14, %s1861_s8 }
  0x47   : > { %530 = vmatpush.bf16.msra.mxu0 %v1165_v1  ;;  %v1152_v14 = vld [vmem:[%s1764_s19 + $0x8] sm:$0xff]  ;;  %v1786_v15 = vld [vmem:[%s1756_s5] sm:$0xf]  ;;  %v1151_v16 = vld [vmem:[%s1764_s19] sm:$0xff]  ;;  %p1463_p1 = scmp.ne.s32.totalorder %s1461_s14, %s1462_s16  ;;  %p1468_p11 = scmp.lt.s32.totalorder %s1466_s7, %s1462_s16 }
  0x48   : > { %619 = vmatpush.bf16.msra.mxu2 %v1157_v4  ;;  %v1288_v17 = vld [vmem:[%s1856_s3] ss:$0 sm:$0xff]  ;;  %v1181_v33 = vld [vmem:[#allocation10 + $0x30] sm:$0xff]  ;;  %v1180_v35 = vld [vmem:[#allocation10 + $0x28] sm:$0xff] }
  0x49   : > { %v1182_v31 = vld [vmem:[#allocation10 + $0x38] sm:$0xff]  ;;  %v1173_v34 = vld [vmem:[#allocation8 + $0x30] sm:$0xff]  ;;  %v1172_v36 = vld [vmem:[#allocation8 + $0x28] sm:$0xff]  ;;  %p1464_p3 = pnand %p1463_p1, %p1720_p4  ;;  %p1469_p12 = por %p1468_p11, %p1467_p10 }
  0x4a   : > { %v1174_v32 = vld [vmem:[#allocation8 + $0x38] sm:$0xff]  ;;  %712 = vmatpush.bf16.msra.mxu3 %v1182_v31  ;;  %v1179_v37 = vld [vmem:[#allocation10 + $0x20] sm:$0xff]  ;;  %v1177_v41 = vld [vmem:[#allocation10 + $0x10] sm:$0xff] }
  0x4b   : > { %531 = vmatpush.bf16.msra.mxu0 %v1164_v3  ;;  %v1171_v38 = vld [vmem:[#allocation8 + $0x20] sm:$0xff]  ;;  %v1178_v39 = vld [vmem:[#allocation10 + $0x18] sm:$0xff]  ;;  %v1169_v42 = vld [vmem:[#allocation8 + $0x10] sm:$0xff]  ;;  %p1465_p9 = pneg %p1464_p3 }
  0x4c   : > { %592 = vmatpush.bf16.xpose.msra.mxu1 %v1157_v4  ;;  %620 = vmatpush.bf16.msra.mxu2 %v1156_v6  ;;  %v1170_v40 = vld [vmem:[#allocation8 + $0x18] sm:$0xff]  ;;  %v1176_v44 = vld [vmem:[#allocation10 + $0x8] sm:$0xff]  ;;  %v1175_v46 = vld [vmem:[#allocation10] sm:$0xff] }
  0x4d   : > { %v1168_v45 = vld [vmem:[#allocation8 + $0x8] sm:$0xff]  ;;  %v1167_v50 = vld [vmem:[#allocation8] sm:$0xff]  ;;  %p1470_p13 = pnand %p1469_p12, %p1465_p9 }
  0x4e   : > { %713 = vmatpush.bf16.msra.mxu3 %v1181_v33 }
  0x4f   : > { %532 = vmatpush.bf16.msra.mxu0 %v1163_v5 }
  0x50   : > { %621 = vmatpush.bf16.msra.mxu2 %v1155_v8 }
  0x52   : > { %714 = vmatpush.bf16.msra.mxu3 %v1180_v35 }
  0x53   : > { %533 = vmatpush.bf16.msra.mxu0 %v1162_v7 }
  0x54   : > { %593 = vmatpush.bf16.xpose.msra.mxu1 %v1156_v6  ;;  %622 = vmatpush.bf16.msra.mxu2 %v1154_v10 }
  0x56   : > { %715 = vmatpush.bf16.msra.mxu3 %v1179_v37 }
  0x57   : > { %534 = vmatpush.bf16.msra.mxu0 %v1161_v9 }
  0x58   : > { %623 = vmatpush.bf16.msra.mxu2 %v1153_v12 }
  0x5a   : > { %716 = vmatpush.bf16.msra.mxu3 %v1178_v39 }
  0x5b   : > { %535 = vmatpush.bf16.msra.mxu0 %v1160_v11 }
  0x5c   : > { %594 = vmatpush.bf16.xpose.msra.mxu1 %v1155_v8  ;;  %624 = vmatpush.bf16.msra.mxu2 %v1152_v14 }
  0x5e   : > { %717 = vmatpush.bf16.msra.mxu3 %v1177_v41 }
  0x5f   : > { %536 = vmatpush.bf16.msra.mxu0 %v1159_v13 }
  0x60   : > { %625 = vmatpush.bf16.msra.mxu2 %v1151_v16 }
  0x62   : > { %537 = vmatmul.bf16.vlgmr.msra.gmra.mxu0 %v1786_v15  ;;  %718 = vmatpush.bf16.msra.mxu3 %v1176_v44 }
  0x63   : > { %773 = vmatpush.bf16.msrb.mxu0 %v1174_v32 }
  0x64   : > { %595 = vmatpush.bf16.xpose.msra.mxu1 %v1154_v10 }
  0x66   : > { %719 = vmatpush.bf16.msra.mxu3 %v1175_v46 }
  0x67   : > { %774 = vmatpush.bf16.msrb.mxu0 %v1173_v34 }
  0x69   : > { %720 = vmatmul.bf16.vlgmr.msra.gmra.mxu3 %v1786_v15 }
  0x6b   : > { %775 = vmatpush.bf16.msrb.mxu0 %v1172_v36 }
  0x6c   : > { %596 = vmatpush.bf16.xpose.msra.mxu1 %v1153_v12 }
  0x6f   : > { %776 = vmatpush.bf16.msrb.mxu0 %v1171_v38 }
  0x73   : > { %777 = vmatpush.bf16.msrb.mxu0 %v1170_v40 }
  0x74   : > { %597 = vmatpush.bf16.xpose.msra.mxu1 %v1152_v14 }
  0x77   : > { %778 = vmatpush.bf16.msrb.mxu0 %v1169_v42 }
  0x7b   : > { %779 = vmatpush.bf16.msrb.mxu0 %v1168_v45 }
  0x7c   : > { %598 = vmatpush.bf16.xpose.msra.mxu1 %v1151_v16 }
  0x7f   : > { %780 = vmatpush.bf16.msrb.mxu0 %v1167_v50 }
  0xdf   : > { %v538_v18 = vpop.f32.mrf.mxu0 }
  0xe0   : > { %v539_v19 = vadd.f32 %v1288_v17, %v538_v18 }
  0xe2   : > { %v542_v20 = vpack.c.bf16 %v539_v19, %v539_v19 }
  0xe4   : > { %599 = vmatmul.bf16.vlgmr.msra.gmra.mxu1 %v542_v20 }
  0xe7   : > { %v540_v21 = vpop.f32.mrf.mxu0 }
  0xec   : > { %v721_v53 = vpop.f32.mrf.mxu3 }
  0xf4   : > { %v723_v55 = vpop.f32.mrf.mxu3 }
 0x161   : > { %v600_v24 = vpop.f32.mrf.mxu1 }
 0x162   : > { %v607_v25 = vsel %vm606_vm0, %v600_v24, -inf }
 0x163   : > { %608 = vmax.xlane.f32.xlu0 %v607_v25 }
 0x169   : > { %v602_v26 = vpop.f32.mrf.mxu1 }
 0x1d6   : > { %v609_v27 = vpop.xlane.xlu0 %608 }
 0x1d7   : > { %v610_v28 = vsub.f32 %v607_v25, %v609_v27 }
 0x1d9   : > { %v611_v29 = vmul.f32 1.442695, %v610_v28 }
 0x1db   : > { %1290 = vpow2.f32 %v611_v29 }
 0x1e1   : > { %v1291_v30 = vpop.eup %1290 }
 0x1e2   : > { %613 = vadd.xlane.f32.xlu0 %v1291_v30 }
 0x255   : > { %v614_v43 = vpop.xlane.xlu0 %613 }
 0x256   : > { %1292 = vrcp.f32 %v614_v43 }
 0x25c   : > { %v1293_v47 = vpop.eup %1292 }
 0x25d   : > { %v616_v48 = vmul.f32 %v1293_v47, %v1291_v30 }
 0x25f   : > { %v617_v49 = vpack.c.bf16 %v616_v48, %v616_v48 }
 0x261   : > { %626 = vmatmul.bf16.vlgmr.msra.gmra.mxu2 %v617_v49  ;;  %793 = vst [vmem:[%s443_s21] sm:$0xf] %v617_v49 }
 0x2e4   : > { %v627_v51 = vpop.f32.mrf.mxu2 }
 0x2e5   : > { %v631_v52 = vpack.c.bf16 %v627_v51, %v627_v51 }
 0x2e7   : > { %781 = vmatmul.bf16.vlgmr.msrb.gmra.mxu0 %v631_v52 }
 0x2ec   : > { %v629_v54 = vpop.f32.mrf.mxu2 }
 0x2ed   : > { %1473 = shalt.err (!%p1470_p13)
}
 0x2ee   : > { %1200 = dma.vmem_to_hbm [thread:$0]  (%p1720_p4), %s829_s20, 64, %s831_s22, %s800_s23   ;;  %v1289_v56 = vld [vmem:[%s1859_s6] ss:$0 sm:$0xff] }
 0x2ef   : > { %s1014_s19 = sshll.u32 %s1750_s2, 3  ;;  %s1146_s11 = sshll.u32 %s1564_s30, 3 }
 0x2f0   : > { %s1889_s26 = sld [smem:[#allocation28_spill]]  ;;  %s436_s13 = scalar_lea.vmem [#allocation11], %s1014_s19 }
 0x2f1   : > { %s813_s24 = sshll.u32 %s436_s13, 4  ;;  %s795_s20 = scalar_lea.sflag [#allocation4], %s1750_s2  ;;  %s814_s24 = int_to_ptr.vmem [resolvable:$true] %s813_s24 }
 0x2f6   : > { %s811_s12 = scalar_lea.hbm %s1889_s26, %s1146_s11  ;;  %s1494_s17 = scalar_lea.hbm %s1889_s26, 16 }
 0x2f7   : > { %s815_s14 = sshll.u32 %s811_s12, 4  ;;  %s816_s14 = int_to_ptr.hbm [resolvable:$true] %s815_s14 }
 0x2f8   : > { %s1488_s22 = sshra.s32 %s816_s14, 4  ;;  %s1489_s22 = int_to_ptr.hbm [resolvable:$true] %s1488_s22 }
 0x2f9   : > { %s1490_s23 = scalar_lea.hbm %s1489_s22, 8  ;;  %p1495_p8 = scmp.lt.s32.totalorder %s1489_s22, %s1889_s26 }
 0x2fa   : > { %p1491_p0 = scmp.ne.s32.totalorder %s1489_s22, %s1490_s23  ;;  %p1496_p1 = scmp.lt.s32.totalorder %s1494_s17, %s1490_s23 }
 0x2fc   : > { %p1492_p2 = pnand %p1491_p0, %p1720_p4  ;;  %p1497_p3 = por %p1496_p1, %p1495_p8 }
 0x2fe   : > { %p1493_p5 = pneg %p1492_p2 }
 0x300   : > { %p1498_p9 = pnand %p1497_p3, %p1493_p5 }
 0x364   : > { %v782_v57 = vpop.f32.mrf.mxu0 }
 0x365   : > { %v783_v58 = vadd.f32 %v782_v57, %v721_v53 }
 0x367   : > { %v790_v59 = vadd.f32 %v1289_v56, %v783_v58 }
 0x369   : > { %1294 = vtanh.f32 %v790_v59 }
 0x36c   : > { %v784_v60 = vpop.f32.mrf.mxu0 }
 0x36f   : > { %v1295_v61 = vpop.eup %1294 }
 0x370   : > { %792 = vst [vmem:[%s436_s13] sm:$0xff] %v1295_v61 }
 0x371   : > { %1501 = shalt.err (!%p1498_p9)
}
 0x372   : > { %1199 = dma.vmem_to_hbm [thread:$0]  (%p1720_p4), %s814_s24, 128, %s816_s14, %s795_s20  }
 0x373 PF: > { %s1890_s2 = sld [smem:[#allocation20_spill]]  ;;  %p1221_p10 = pnand %p1002_p6, %p1728_p7 }
 0x375   : > { %p1222_p11 = pneg %p1221_p10 }
 0x379   : > { %s842_s27 = sand.u32 1, %s1890_s2  }
 0x37a   : > { %s843_s29 = scalar_lea.sflag [#allocation4], %s842_s27 }
 0x37b   : > { %1543 = dma.done.wait (%p1222_p11), %s843_s29, 128  }
 0x37c   : > { %1545 = vsyncadd (%p1222_p11), %s843_s29, 4294967168  ;;  %s853_s15 = scalar_lea.sflag [#allocation13], %s842_s27 }
 0x37d   : > { %1547 = dma.done.wait (%p1222_p11), %s853_s15, 64  }
 0x37e   : > { %1549 = vsyncadd (%p1222_p11), %s853_s15, 4294967232  ;;  %s32_s10 = sadd.s32 1, %s1572_s10   ;;  %s1892_s25 = sld [smem:[#allocation21_spill]] }
 0x37f   : > { %p29_p12 = scmp.ge.s32.totalorder %s32_s10, 4   ;;  %s1893_s29 = sld [smem:[#allocation23_spill]] }
 0x380   : > { %s1894_s19 = sld [smem:[#allocation22_spill]]  ;;  %s1895_s27 = smov %s1556_s28 }
 0x381   : > { %s1897_s30 = smov %s1568_s9 }
 0x382   :  { %31 = sbr.rel (!%p29_p12) target bundleno = 16 (0x10), region = 135 }
 0x384   : > { %s1896_s28 = smov %s1892_s25 }
 0x386   : > { %s1898_s9 = smov %s1894_s19 }
 0x387   :  { %859 = vsyncpa [#allocation3], 1 }
 0x388   :  { %861 = vsyncpa [#allocation3 + $0x1], 1 }
 0x389   :  { %862 = vsyncpa [#allocation6], 1 }
 0x38a   :  { %864 = vsyncpa [#allocation6 + $0x1], 1 }
 0x38b   :  { %865 = vsyncpa [#allocation9], 1 }
 0x38c   :  { %866 = vsyncpa [#allocation4], 1 }
 0x38d   :  { %868 = vsyncpa [#allocation4 + $0x1], 1 }
 0x38e   :  { %869 = vsyncpa [#allocation13], 1 }
 0x38f   :  { %871 = vsyncpa [#allocation13 + $0x1], 1 }

</bundles_post_ra>
